<compile_context>
chip_gen: v5e
topology: v5e:2x2
jax: 0.10.0
libtpu: 0.0.40
codegen_flags: <defaults>
</compile_context>

<pallas_src>
import functools

import jax
import jax.numpy as jnp
from jax.experimental import pallas as pl
from jax.experimental.pallas import tpu as pltpu

_LANE = 128
_SUBLANE = 8


def _cdiv(a: int, b: int) -> int:
    return (a + b - 1) // b


def _round_up(x: int, m: int) -> int:
    return _cdiv(x, m) * m


def _fused_mlp_kernel(*refs, num_layers: int, mxu_dtype):
    """refs = (x_ref, w0, b0, w1, b1, ..., w_{L-1}, b_{L-1}, o_ref).

    Chains L fused (matmul + bias [+ SiLU]) stages; intermediate activations
    never leave VMEM/vregs.  MXU inputs are `mxu_dtype` (bf16 by default),
    accumulation and the SiLU epilogue are f32 (required on v5e: no bf16 VPU/EUP).
    """
    x_ref = refs[0]
    o_ref = refs[-1]

    h = x_ref[...].astype(jnp.float32)
    for li in range(num_layers):
        w_ref = refs[1 + 2 * li]
        b_ref = refs[2 + 2 * li]
        acc = jnp.dot(h.astype(mxu_dtype), w_ref[...],
                      preferred_element_type=jnp.float32)
        acc = acc + b_ref[...].astype(jnp.float32)
        if li < num_layers - 1:
            # SiLU(x) = x * sigmoid(x); sigmoid goes to the EUP slot (free-ish).
            acc = acc * jax.nn.sigmoid(acc)
        h = acc
    o_ref[...] = h.astype(o_ref.dtype)


def _batch_tiling(M: int, block_m: int, *,
                  min_rows_per_tile: int = 256,
                  megacore_tiles: int = 2):
    """Pick (tm, m_pad) with balanced tiles and >=2 tiles for v7x megacore."""
    n_tiles = _cdiv(M, block_m)
    # Only force multiple tiles if each tile still has >= min_rows_per_tile rows
    # (otherwise the 0.35us/step overhead dominates and megacore gains nothing).
    if M >= megacore_tiles * min_rows_per_tile:
        n_tiles = max(n_tiles, megacore_tiles)
    tm = _round_up(_cdiv(M, n_tiles), _SUBLANE)
    n_tiles = _cdiv(M, tm)
    return tm, n_tiles * tm


def _pick_vmem_limit(required_bytes: int) -> int:
    """Explicit VMEM budget: enough for the working set, capped below capacity."""
    cap = 64 << 20  # conservative default = v7x per-TC physical VMEM
    try:
        cap = int(pltpu.get_tpu_info().vmem_capacity_bytes)
    except Exception:
        pass
    return int(max(32 << 20, min(required_bytes + (8 << 20), cap - (16 << 20))))


def mlp_forward(x, params, *, block_m: int = 512, mxu_dtype=jnp.bfloat16,
                pad_out_lanes: bool = True):
    """Fused forward pass matching MLP.forward (hidden layers SiLU, last plain)."""
    M, in_dim = x.shape
    num_layers = len(params)
    out_dim = params[-1][0].shape[1]
    dtype = x.dtype
    out_itemsize = jnp.dtype(dtype).itemsize

    # ---- lane-dense output: optionally pad final N to a multiple of 128 ----
    # (pad_out_lanes=False is the mem-bound alternative for tiny out_dim on v5e.)
    n_pad = _round_up(out_dim, _LANE) if pad_out_lanes else out_dim

    padded_params = []
    for li, (w, b) in enumerate(params):
        if li == num_layers - 1 and n_pad != out_dim:
            w = jnp.pad(w, ((0, 0), (0, n_pad - out_dim)))
            b = jnp.pad(b, ((0, n_pad - out_dim),))
        # bf16 weights for the native MXU path; bias stays f32 for the epilogue.
        padded_params.append((w.astype(mxu_dtype),
                              b.astype(jnp.float32).reshape(1, -1)))

    # ---- balanced batch tiling (>=2 tiles when M is large -> v7x megacore) ----
    tm, m_pad = _batch_tiling(M, block_m)
    x_p = x if m_pad == M else jnp.pad(x, ((0, m_pad - M), (0, 0)))
    grid = (m_pad // tm,)

    # ---- VMEM budget ----
    # TODO(synk): if hidden/K grow so the full-(K,N) weights no longer fit the
    # per-generation VMEM budget (cut over at ~half the size on v7x's 64 MiB vs
    # v5e/v6e's 128 MiB), add K/N grid axes with an f32 accumulator and a
    # smaller tm on v7x.
    w_bytes = sum(w.size * w.dtype.itemsize + b.size * b.dtype.itemsize
                  for w, b in padded_params)
    max_width = max(w.shape[1] for w, _ in padded_params)
    required = (2 * tm * in_dim * x_p.dtype.itemsize          # input tile (2 bufs)
                + 2 * tm * n_pad * out_itemsize               # output tile (2 bufs)
                + 2 * w_bytes                                  # weights (worst case 2 bufs)
                + 2 * tm * max_width * 4)                      # f32 intermediates
    vmem_limit = _pick_vmem_limit(required)

    # ---- cost estimate so XLA treats the fused call as real work ----
    flops = sum(2 * m_pad * w.shape[0] * w.shape[1] for w, _ in padded_params)
    transcendentals = sum(m_pad * w.shape[1] for w, _ in padded_params[:-1])
    bytes_accessed = (x_p.size * x_p.dtype.itemsize + m_pad * n_pad * out_itemsize
                      + w_bytes)
    cost = pl.CostEstimate(flops=flops, transcendentals=transcendentals,
                           bytes_accessed=bytes_accessed)

    kernel = functools.partial(_fused_mlp_kernel, num_layers=num_layers,
                               mxu_dtype=mxu_dtype)

    def build_call(single_buffer_weights: bool):
        weight_kwargs = ({"pipeline_mode": pl.Buffered(1)}
                         if single_buffer_weights else {})
        in_specs = [pl.BlockSpec((tm, in_dim), lambda i: (i, 0))]
        for w, b in padded_params:
            # Grid-invariant blocks: constant index_map, single-buffered.
            in_specs.append(pl.BlockSpec(w.shape, lambda i: (0, 0), **weight_kwargs))
            in_specs.append(pl.BlockSpec(b.shape, lambda i: (0, 0), **weight_kwargs))
        out_specs = pl.BlockSpec((tm, n_pad), lambda i: (i, 0))
        return pl.pallas_call(
            kernel,
            out_shape=jax.ShapeDtypeStruct((m_pad, n_pad), dtype),
            grid_spec=pltpu.PrefetchScalarGridSpec(
                num_scalar_prefetch=0,
                grid=grid,
                in_specs=in_specs,
                out_specs=out_specs,
            ),
            compiler_params=pltpu.CompilerParams(
                dimension_semantics=("parallel",),
                vmem_limit_bytes=vmem_limit,
            ),
            cost_estimate=cost,
        )

    flat_args = [x_p]
    for w, b in padded_params:
        flat_args += [w, b]

    try:
        out = build_call(True)(*flat_args)
    except Exception:
        # Fallback if this jax version rejects Buffered(1) on pipelined inputs.
        out = build_call(False)(*flat_args)

    if m_pad == M and n_pad == out_dim:
        return out
    return out[:M, :out_dim]


def init_mlp_params(key, in_dim, out_dim, hidden_dim, num_hidden, dtype=jnp.float32):
    """Deterministic init mirroring torch.nn.Linear default U(-1/sqrt(fan_in), +)."""
    dims = [in_dim] + [hidden_dim] * num_hidden + [out_dim]
    params = []
    for fan_in, fan_out in zip(dims[:-1], dims[1:]):
        key, kw, kb = jax.random.split(key, 3)
        bound = 1.0 / (fan_in ** 0.5)
        w = jax.random.uniform(kw, (fan_in, fan_out), dtype, -bound, bound)
        b = jax.random.uniform(kb, (fan_out,), dtype, -bound, bound)
        params.append((w, b))
    return params


def mlp_reference(x, params, mxu_dtype=jnp.bfloat16):
    """Pure-JAX reference matching the kernel's bf16-matmul / f32-epilogue math."""
    n_layers = len(params)
    h = x.astype(jnp.float32)
    for li, (w, b) in enumerate(params):
        h = jnp.dot(h.astype(mxu_dtype), w.astype(mxu_dtype),
                    preferred_element_type=jnp.float32) + b.astype(jnp.float32)
        if li < n_layers - 1:
            h = h * jax.nn.sigmoid(h)
    return h.astype(x.dtype)


if __name__ == "__main__":
    # Small shapes consistent with the module: MLP(in_dim=32, out_dim=16,
    # hidden_dim=128, num_hidden=2, hidden_actv=SiLU, out_actv=None).
    batch, in_dim, out_dim, hidden_dim, num_hidden = 16, 32, 16, 128, 2

    key = jax.random.PRNGKey(0)
    key, kx = jax.random.split(key)
    x = jax.random.normal(kx, (batch, in_dim), jnp.float32)

    params = init_mlp_params(key, in_dim, out_dim, hidden_dim, num_hidden)

    out = jax.block_until_ready(mlp_forward(x, params))
    ref = mlp_reference(x, params)
    assert out.shape == (batch, out_dim), out.shape
    assert jnp.allclose(out, ref, atol=2e-3, rtol=2e-3), "mismatch vs reference"

    # Ragged / multi-tile batch to exercise padding + multi-step grid logic.
    key, kx2 = jax.random.split(key)
    x2 = jax.random.normal(kx2, (37, in_dim), jnp.float32)
    out2 = jax.block_until_ready(mlp_forward(x2, params, block_m=16))
    ref2 = mlp_reference(x2, params)
    assert out2.shape == (37, out_dim), out2.shape
    assert jnp.allclose(out2, ref2, atol=2e-3, rtol=2e-3), "mismatch (ragged batch)"

    print("KERNEL_OK")
</pallas_src>

<mosaic_0001>
module attributes {stable_mosaic.version = 11 : i64} {
  func.func @_fused_mlp_kernel(%arg0: i32, %arg1: memref<16x32xf32, #tpu.memory_space<vmem>>, %arg2: memref<32x128xbf16, #tpu.memory_space<vmem>>, %arg3: memref<1x128xf32, #tpu.memory_space<vmem>>, %arg4: memref<128x128xbf16, #tpu.memory_space<vmem>>, %arg5: memref<1x128xf32, #tpu.memory_space<vmem>>, %arg6: memref<128x128xbf16, #tpu.memory_space<vmem>>, %arg7: memref<1x128xf32, #tpu.memory_space<vmem>>, %arg8: memref<16x128xf32, #tpu.memory_space<vmem>>) attributes {dimension_semantics = [#tpu.dimension_semantics<parallel>], iteration_bounds = array<i64: 1>, scalar_prefetch = 0 : i64, scratch_operands = 0 : i64, tpu.core_type = #tpu.core_type<tc>, window_params = [{transform_indices = @transform_0, window_bounds = array<i64: 16, 32>}, {pipeline_mode = #tpu.pipeline_mode<synchronous>, transform_indices = @transform_1, window_bounds = array<i64: 32, 128>}, {pipeline_mode = #tpu.pipeline_mode<synchronous>, transform_indices = @transform_2, window_bounds = array<i64: 1, 128>}, {pipeline_mode = #tpu.pipeline_mode<synchronous>, transform_indices = @transform_3, window_bounds = array<i64: 128, 128>}, {pipeline_mode = #tpu.pipeline_mode<synchronous>, transform_indices = @transform_4, window_bounds = array<i64: 1, 128>}, {pipeline_mode = #tpu.pipeline_mode<synchronous>, transform_indices = @transform_5, window_bounds = array<i64: 128, 128>}, {pipeline_mode = #tpu.pipeline_mode<synchronous>, transform_indices = @transform_6, window_bounds = array<i64: 1, 128>}, {transform_indices = @transform_7, window_bounds = array<i64: 16, 128>}]} {
    %c0 = arith.constant 0 : index
    %c0_0 = arith.constant 0 : index
    %0 = vector.load %arg1[%c0, %c0_0] : memref<16x32xf32, #tpu.memory_space<vmem>>, vector<16x32xf32>
    %1 = arith.truncf %0 : vector<16x32xf32> to vector<16x32xbf16>
    %c0_1 = arith.constant 0 : index
    %c0_2 = arith.constant 0 : index
    %2 = vector.load %arg2[%c0_1, %c0_2] : memref<32x128xbf16, #tpu.memory_space<vmem>>, vector<32x128xbf16>
    %cst = arith.constant dense<0.000000e+00> : vector<16x128xf32>
    %3 = tpu.matmul %1, %2, %cst {dimension_numbers = #tpu.dot_dimension_numbers<[1], [0], [0], [1], [0, 0, 1, 1], [], []>} : vector<16x32xbf16>, vector<32x128xbf16>, vector<16x128xf32> -> vector<16x128xf32>
    %c0_3 = arith.constant 0 : index
    %c0_4 = arith.constant 0 : index
    %4 = vector.load %arg3[%c0_3, %c0_4] : memref<1x128xf32, #tpu.memory_space<vmem>>, vector<1x128xf32>
    %5 = vector.broadcast %4 : vector<1x128xf32> to vector<16x128xf32>
    %6 = arith.addf %3, %5 : vector<16x128xf32>
    %7 = arith.negf %6 : vector<16x128xf32>
    %8 = math.exp %7 : vector<16x128xf32>
    %cst_5 = arith.constant 1.000000e+00 : f32
    %9 = vector.broadcast %cst_5 : f32 to vector<16x128xf32>
    %10 = arith.addf %9, %8 : vector<16x128xf32>
    %11 = arith.divf %9, %10 : vector<16x128xf32>
    %12 = arith.mulf %6, %11 : vector<16x128xf32>
    %13 = arith.truncf %12 : vector<16x128xf32> to vector<16x128xbf16>
    %c0_6 = arith.constant 0 : index
    %c0_7 = arith.constant 0 : index
    %14 = vector.load %arg4[%c0_6, %c0_7] : memref<128x128xbf16, #tpu.memory_space<vmem>>, vector<128x128xbf16>
    %cst_8 = arith.constant dense<0.000000e+00> : vector<16x128xf32>
    %15 = tpu.matmul %13, %14, %cst_8 {dimension_numbers = #tpu.dot_dimension_numbers<[1], [0], [0], [1], [0, 0, 1, 1], [], []>} : vector<16x128xbf16>, vector<128x128xbf16>, vector<16x128xf32> -> vector<16x128xf32>
    %c0_9 = arith.constant 0 : index
    %c0_10 = arith.constant 0 : index
    %16 = vector.load %arg5[%c0_9, %c0_10] : memref<1x128xf32, #tpu.memory_space<vmem>>, vector<1x128xf32>
    %17 = vector.broadcast %16 : vector<1x128xf32> to vector<16x128xf32>
    %18 = arith.addf %15, %17 : vector<16x128xf32>
    %19 = arith.negf %18 : vector<16x128xf32>
    %20 = math.exp %19 : vector<16x128xf32>
    %cst_11 = arith.constant 1.000000e+00 : f32
    %21 = vector.broadcast %cst_11 : f32 to vector<16x128xf32>
    %22 = arith.addf %21, %20 : vector<16x128xf32>
    %23 = arith.divf %21, %22 : vector<16x128xf32>
    %24 = arith.mulf %18, %23 : vector<16x128xf32>
    %25 = arith.truncf %24 : vector<16x128xf32> to vector<16x128xbf16>
    %c0_12 = arith.constant 0 : index
    %c0_13 = arith.constant 0 : index
    %26 = vector.load %arg6[%c0_12, %c0_13] : memref<128x128xbf16, #tpu.memory_space<vmem>>, vector<128x128xbf16>
    %cst_14 = arith.constant dense<0.000000e+00> : vector<16x128xf32>
    %27 = tpu.matmul %25, %26, %cst_14 {dimension_numbers = #tpu.dot_dimension_numbers<[1], [0], [0], [1], [0, 0, 1, 1], [], []>} : vector<16x128xbf16>, vector<128x128xbf16>, vector<16x128xf32> -> vector<16x128xf32>
    %c0_15 = arith.constant 0 : index
    %c0_16 = arith.constant 0 : index
    %28 = vector.load %arg7[%c0_15, %c0_16] : memref<1x128xf32, #tpu.memory_space<vmem>>, vector<1x128xf32>
    %29 = vector.broadcast %28 : vector<1x128xf32> to vector<16x128xf32>
    %30 = arith.addf %27, %29 : vector<16x128xf32>
    %c0_17 = arith.constant 0 : index
    %c0_18 = arith.constant 0 : index
    %31 = vector.load %arg8[%c0_17, %c0_18] : memref<16x128xf32, #tpu.memory_space<vmem>>, vector<16x128xf32>
    tpu.vector_store %arg8[%c0_17, %c0_18], %30 {strides = array<i32>} : memref<16x128xf32, #tpu.memory_space<vmem>>, vector<16x128xf32>,
    return
  }
  func.func @transform_0(%arg0: i32) -> (i32, i32) {
    %c0_i32 = arith.constant 0 : i32
    %c0_i32_0 = arith.constant 0 : i32
    return %arg0, %c0_i32 : i32, i32
  }
  func.func @transform_1(%arg0: i32) -> (i32, i32) {
    %c0_i32 = arith.constant 0 : i32
    %c0_i32_0 = arith.constant 0 : i32
    %c0_i32_1 = arith.constant 0 : i32
    return %c0_i32, %c0_i32_0 : i32, i32
  }
  func.func @transform_2(%arg0: i32) -> (i32, i32) {
    %c0_i32 = arith.constant 0 : i32
    %c0_i32_0 = arith.constant 0 : i32
    %c0_i32_1 = arith.constant 0 : i32
    return %c0_i32, %c0_i32_0 : i32, i32
  }
  func.func @transform_3(%arg0: i32) -> (i32, i32) {
    %c0_i32 = arith.constant 0 : i32
    %c0_i32_0 = arith.constant 0 : i32
    %c0_i32_1 = arith.constant 0 : i32
    return %c0_i32, %c0_i32_0 : i32, i32
  }
  func.func @transform_4(%arg0: i32) -> (i32, i32) {
    %c0_i32 = arith.constant 0 : i32
    %c0_i32_0 = arith.constant 0 : i32
    %c0_i32_1 = arith.constant 0 : i32
    return %c0_i32, %c0_i32_0 : i32, i32
  }
  func.func @transform_5(%arg0: i32) -> (i32, i32) {
    %c0_i32 = arith.constant 0 : i32
    %c0_i32_0 = arith.constant 0 : i32
    %c0_i32_1 = arith.constant 0 : i32
    return %c0_i32, %c0_i32_0 : i32, i32
  }
  func.func @transform_6(%arg0: i32) -> (i32, i32) {
    %c0_i32 = arith.constant 0 : i32
    %c0_i32_0 = arith.constant 0 : i32
    %c0_i32_1 = arith.constant 0 : i32
    return %c0_i32, %c0_i32_0 : i32, i32
  }
  func.func @transform_7(%arg0: i32) -> (i32, i32) {
    %c0_i32 = arith.constant 0 : i32
    %c0_i32_0 = arith.constant 0 : i32
    return %arg0, %c0_i32 : i32, i32
  }
}

module attributes {stable_mosaic.version = 11 : i64} {
  func.func @_fused_mlp_kernel(%arg0: i32, %arg1: memref<16x32xf32, #tpu.memory_space<vmem>>, %arg2: memref<32x128xbf16, #tpu.memory_space<vmem>>, %arg3: memref<1x128xf32, #tpu.memory_space<vmem>>, %arg4: memref<128x128xbf16, #tpu.memory_space<vmem>>, %arg5: memref<1x128xf32, #tpu.memory_space<vmem>>, %arg6: memref<128x128xbf16, #tpu.memory_space<vmem>>, %arg7: memref<1x128xf32, #tpu.memory_space<vmem>>, %arg8: memref<16x128xf32, #tpu.memory_space<vmem>>) attributes {dimension_semantics = [#tpu.dimension_semantics<parallel>], iteration_bounds = array<i64: 1>, scalar_prefetch = 0 : i64, scratch_operands = 0 : i64, tpu.core_type = #tpu.core_type<tc>, window_params = [{transform_indices = @transform_0, window_bounds = array<i64: 16, 32>}, {pipeline_mode = #tpu.pipeline_mode<synchronous>, transform_indices = @transform_1, window_bounds = array<i64: 32, 128>}, {pipeline_mode = #tpu.pipeline_mode<synchronous>, transform_indices = @transform_2, window_bounds = array<i64: 1, 128>}, {pipeline_mode = #tpu.pipeline_mode<synchronous>, transform_indices = @transform_3, window_bounds = array<i64: 128, 128>}, {pipeline_mode = #tpu.pipeline_mode<synchronous>, transform_indices = @transform_4, window_bounds = array<i64: 1, 128>}, {pipeline_mode = #tpu.pipeline_mode<synchronous>, transform_indices = @transform_5, window_bounds = array<i64: 128, 128>}, {pipeline_mode = #tpu.pipeline_mode<synchronous>, transform_indices = @transform_6, window_bounds = array<i64: 1, 128>}, {transform_indices = @transform_7, window_bounds = array<i64: 16, 128>}]} {
    %c0 = arith.constant 0 : index
    %c0_0 = arith.constant 0 : index
    %0 = vector.load %arg1[%c0, %c0_0] : memref<16x32xf32, #tpu.memory_space<vmem>>, vector<16x32xf32>
    %1 = arith.truncf %0 : vector<16x32xf32> to vector<16x32xbf16>
    %c0_1 = arith.constant 0 : index
    %c0_2 = arith.constant 0 : index
    %2 = vector.load %arg2[%c0_1, %c0_2] : memref<32x128xbf16, #tpu.memory_space<vmem>>, vector<32x128xbf16>
    %cst = arith.constant dense<0.000000e+00> : vector<16x128xf32>
    %3 = tpu.matmul %1, %2, %cst {dimension_numbers = #tpu.dot_dimension_numbers<[1], [0], [0], [1], [0, 0, 1, 1], [], []>} : vector<16x32xbf16>, vector<32x128xbf16>, vector<16x128xf32> -> vector<16x128xf32>
    %c0_3 = arith.constant 0 : index
    %c0_4 = arith.constant 0 : index
    %4 = vector.load %arg3[%c0_3, %c0_4] : memref<1x128xf32, #tpu.memory_space<vmem>>, vector<1x128xf32>
    %5 = vector.broadcast %4 : vector<1x128xf32> to vector<16x128xf32>
    %6 = arith.addf %3, %5 : vector<16x128xf32>
    %7 = arith.negf %6 : vector<16x128xf32>
    %8 = math.exp %7 : vector<16x128xf32>
    %cst_5 = arith.constant 1.000000e+00 : f32
    %9 = vector.broadcast %cst_5 : f32 to vector<16x128xf32>
    %10 = arith.addf %9, %8 : vector<16x128xf32>
    %11 = arith.divf %9, %10 : vector<16x128xf32>
    %12 = arith.mulf %6, %11 : vector<16x128xf32>
    %13 = arith.truncf %12 : vector<16x128xf32> to vector<16x128xbf16>
    %c0_6 = arith.constant 0 : index
    %c0_7 = arith.constant 0 : index
    %14 = vector.load %arg4[%c0_6, %c0_7] : memref<128x128xbf16, #tpu.memory_space<vmem>>, vector<128x128xbf16>
    %cst_8 = arith.constant dense<0.000000e+00> : vector<16x128xf32>
    %15 = tpu.matmul %13, %14, %cst_8 {dimension_numbers = #tpu.dot_dimension_numbers<[1], [0], [0], [1], [0, 0, 1, 1], [], []>} : vector<16x128xbf16>, vector<128x128xbf16>, vector<16x128xf32> -> vector<16x128xf32>
    %c0_9 = arith.constant 0 : index
    %c0_10 = arith.constant 0 : index
    %16 = vector.load %arg5[%c0_9, %c0_10] : memref<1x128xf32, #tpu.memory_space<vmem>>, vector<1x128xf32>
    %17 = vector.broadcast %16 : vector<1x128xf32> to vector<16x128xf32>
    %18 = arith.addf %15, %17 : vector<16x128xf32>
    %19 = arith.negf %18 : vector<16x128xf32>
    %20 = math.exp %19 : vector<16x128xf32>
    %cst_11 = arith.constant 1.000000e+00 : f32
    %21 = vector.broadcast %cst_11 : f32 to vector<16x128xf32>
    %22 = arith.addf %21, %20 : vector<16x128xf32>
    %23 = arith.divf %21, %22 : vector<16x128xf32>
    %24 = arith.mulf %18, %23 : vector<16x128xf32>
    %25 = arith.truncf %24 : vector<16x128xf32> to vector<16x128xbf16>
    %c0_12 = arith.constant 0 : index
    %c0_13 = arith.constant 0 : index
    %26 = vector.load %arg6[%c0_12, %c0_13] : memref<128x128xbf16, #tpu.memory_space<vmem>>, vector<128x128xbf16>
    %cst_14 = arith.constant dense<0.000000e+00> : vector<16x128xf32>
    %27 = tpu.matmul %25, %26, %cst_14 {dimension_numbers = #tpu.dot_dimension_numbers<[1], [0], [0], [1], [0, 0, 1, 1], [], []>} : vector<16x128xbf16>, vector<128x128xbf16>, vector<16x128xf32> -> vector<16x128xf32>
    %c0_15 = arith.constant 0 : index
    %c0_16 = arith.constant 0 : index
    %28 = vector.load %arg7[%c0_15, %c0_16] : memref<1x128xf32, #tpu.memory_space<vmem>>, vector<1x128xf32>
    %29 = vector.broadcast %28 : vector<1x128xf32> to vector<16x128xf32>
    %30 = arith.addf %27, %29 : vector<16x128xf32>
    %c0_17 = arith.constant 0 : index
    %c0_18 = arith.constant 0 : index
    %31 = vector.load %arg8[%c0_17, %c0_18] : memref<16x128xf32, #tpu.memory_space<vmem>>, vector<16x128xf32>
    tpu.vector_store %arg8[%c0_17, %c0_18], %30 {strides = array<i32>} : memref<16x128xf32, #tpu.memory_space<vmem>>, vector<16x128xf32>,
    return
  }
  func.func @transform_0(%arg0: i32) -> (i32, i32) {
    %c0_i32 = arith.constant 0 : i32
    %c0_i32_0 = arith.constant 0 : i32
    return %arg0, %c0_i32 : i32, i32
  }
  func.func @transform_1(%arg0: i32) -> (i32, i32) {
    %c0_i32 = arith.constant 0 : i32
    %c0_i32_0 = arith.constant 0 : i32
    %c0_i32_1 = arith.constant 0 : i32
    return %c0_i32, %c0_i32_0 : i32, i32
  }
  func.func @transform_2(%arg0: i32) -> (i32, i32) {
    %c0_i32 = arith.constant 0 : i32
    %c0_i32_0 = arith.constant 0 : i32
    %c0_i32_1 = arith.constant 0 : i32
    return %c0_i32, %c0_i32_0 : i32, i32
  }
  func.func @transform_3(%arg0: i32) -> (i32, i32) {
    %c0_i32 = arith.constant 0 : i32
    %c0_i32_0 = arith.constant 0 : i32
    %c0_i32_1 = arith.constant 0 : i32
    return %c0_i32, %c0_i32_0 : i32, i32
  }
  func.func @transform_4(%arg0: i32) -> (i32, i32) {
    %c0_i32 = arith.constant 0 : i32
    %c0_i32_0 = arith.constant 0 : i32
    %c0_i32_1 = arith.constant 0 : i32
    return %c0_i32, %c0_i32_0 : i32, i32
  }
  func.func @transform_5(%arg0: i32) -> (i32, i32) {
    %c0_i32 = arith.constant 0 : i32
    %c0_i32_0 = arith.constant 0 : i32
    %c0_i32_1 = arith.constant 0 : i32
    return %c0_i32, %c0_i32_0 : i32, i32
  }
  func.func @transform_6(%arg0: i32) -> (i32, i32) {
    %c0_i32 = arith.constant 0 : i32
    %c0_i32_0 = arith.constant 0 : i32
    %c0_i32_1 = arith.constant 0 : i32
    return %c0_i32, %c0_i32_0 : i32, i32
  }
  func.func @transform_7(%arg0: i32) -> (i32, i32) {
    %c0_i32 = arith.constant 0 : i32
    %c0_i32_0 = arith.constant 0 : i32
    return %arg0, %c0_i32 : i32, i32
  }
}

</mosaic_0001>

<bundles_post_ra>
// kernel: tpu_custom_call.1
= control target key start
LH: loop header
LB: loop body
LE: loop exit
PB: predicated region body
PF: predicated region fallthrough
CT: control target
= control target key end

     0   :  { %12 = vsyncpa [#allocation3], 0  ;;  %s731_s0 = inlined_call_operand.hbm [shape: f32[16,32], index: 0, kind: input, shape index: {}]   ;;  %s732_s1 = inlined_call_operand.hbm [shape: bf16[32,128], index: 1, kind: input, shape index: {}]   ;;  %s733_s2 = inlined_call_operand.vmem [shape: f32[1,128], index: 2, kind: input, shape index: {}]   ;;  %s734_s3 = inlined_call_operand.hbm [shape: bf16[128,128], index: 3, kind: input, shape index: {}]   ;;  %s735_s4 = inlined_call_operand.vmem [shape: f32[1,128], index: 4, kind: input, shape index: {}]   ;;  %s736_s5 = inlined_call_operand.hbm [shape: bf16[128,128], index: 5, kind: input, shape index: {}]   ;;  %s737_s6 = inlined_call_operand.vmem [shape: f32[1,128], index: 6, kind: input, shape index: {}]   ;;  %s738_s7 = inlined_call_operand.hbm [shape: f32[16,128], index: 7, kind: output, shape index: {}]  }
   0x1   :  { %13 = vsyncpa [#allocation6], 0 }
   0x2   :  { %14 = vsyncpa [#allocation9], 0  ;;  %s33_s26 = sshll.u32 %s732_s1, 4  ;;  %s34_s26 = int_to_ptr.hbm [resolvable:$true] %s33_s26 }
   0x3   :  { %15 = vsyncpa [#allocation4], 0  ;;  %s652_s27 = smov [#allocation5]   ;;  %s20_s8 = sshll.u32 %s731_s0, 4  ;;  %s21_s8 = int_to_ptr.hbm [resolvable:$true] %s20_s8 }
   0x4   :  { %s35_s28 = sshll.u32 %s652_s27, 4  ;;  %s653_s9 = smov 64   ;;  %s36_s28 = int_to_ptr.vmem [resolvable:$true] %s35_s28 }
   0x5   :  { %s654_s10 = smov 4   ;;  %s655_s11 = smov [#allocation2]  }
   0x6   :  { %41 = dma.hbm_to_vmem [thread:$0]  %s34_s26, 256, %s36_s28, [#allocation6], %s653_s9, %s653_s9, %s654_s10  }
   0x7   :  { %s22_s12 = sshll.u32 %s655_s11, 4  ;;  %s656_s13 = smov 128   ;;  %s23_s12 = int_to_ptr.vmem [resolvable:$true] %s22_s12 }
   0x8   :  { %s657_s14 = smov 8   ;;  %s48_s16 = sshll.u32 %s734_s3, 4  ;;  %s49_s16 = int_to_ptr.hbm [resolvable:$true] %s48_s16 }
   0x9   :  { %28 = dma.hbm_to_vmem [thread:$0]  %s21_s8, 256, %s23_s12, [#allocation3], %s656_s13, %s656_s13, %s657_s14  }
   0xa   :  { %s658_s17 = smov [#allocation7]   ;;  %s63_s20 = sshll.u32 %s736_s5, 4  ;;  %s64_s20 = int_to_ptr.hbm [resolvable:$true] %s63_s20 }
   0xb   :  { %s50_s0 = sshll.u32 %s658_s17, 4  ;;  %s659_s21 = smov [#allocation8]   ;;  %s51_s0 = int_to_ptr.vmem [resolvable:$true] %s50_s0 }
   0xc   :  { %56 = dma.hbm_to_vmem [thread:$0]  %s49_s16, 1024, %s51_s0, [#allocation6], %s653_s9, %s653_s9, %s654_s10  }
   0xd   :  { %s65_s22 = sshll.u32 %s659_s21, 4  ;;  %s66_s22 = int_to_ptr.vmem [resolvable:$true] %s65_s22 }
   0xe   :  { %71 = dma.hbm_to_vmem [thread:$0]  %s64_s20, 1024, %s66_s22, [#allocation9], %s653_s9, %s653_s9, %s654_s10  }
   0xf   :  { %644 = dma.done.wait [#allocation3], 256  }
  0x10   :  { %645 = vsyncadd [#allocation3], 4294967040 }
  0x11   :  { %646 = dma.done.wait [#allocation6], 1280  }
  0x12   :  { %647 = vsyncadd [#allocation6], 4294966016 }
  0x13   :  { %648 = dma.done.wait [#allocation9], 1024  }
  0x14   :  { %649 = vsyncadd [#allocation9], 4294966272  ;;  %v479_v0 = vld [vmem:[#allocation5 + $0x8] sm:$0xff]  ;;  %v478_v1 = vld [vmem:[#allocation5] sm:$0xff]  ;;  %vm114_vm0 = vcmask 261120   ;;  %s660_s25 = smov [#allocation10]  }
  0x15   :  { %v91_v2 = vld [vmem:[#allocation2] sm:$0xff]  ;;  %124 = vmatpush.bf16.msra.mxu0 %v479_v0  ;;  %v92_v3 = vld [vmem:[#allocation2 + $0x8] sm:$0xff]  ;;  %v487_v5 = vld [vmem:[#allocation7 + $0x38] sm:$0xff]  ;;  %s384_s26 = sshll.u32 %s660_s25, 4  ;;  %s386_s29 = sshll.u32 %s738_s7, 4  ;;  %s385_s26 = int_to_ptr.vmem [resolvable:$true] %s384_s26  ;;  %s387_s29 = int_to_ptr.hbm [resolvable:$true] %s386_s29 }
  0x16   :  { %v93_v4 = vpack.c.bf16 %v92_v3, %v91_v2  ;;  %241 = vmatpush.bf16.msra.mxu1 %v487_v5  ;;  %v486_v6 = vld [vmem:[#allocation7 + $0x30] sm:$0xff]  ;;  %v485_v7 = vld [vmem:[#allocation7 + $0x28] sm:$0xff]  ;;  %v484_v8 = vld [vmem:[#allocation7 + $0x20] sm:$0xff] }
  0x17   :  { %v483_v9 = vld [vmem:[#allocation7 + $0x18] sm:$0xff]  ;;  %v505_v10 = vld [vmem:[%s733_s2] ss:$0 sm:$0xff]  ;;  %v482_v11 = vld [vmem:[#allocation7 + $0x10] sm:$0xff] }
  0x18   :  { %v481_v14 = vld [vmem:[#allocation7 + $0x8] sm:$0xff]  ;;  %v480_v16 = vld [vmem:[#allocation7] sm:$0xff]  ;;  %v495_v47 = vld [vmem:[#allocation8 + $0x38] sm:$0xff] }
  0x19   :  { %125 = vmatpush.bf16.msra.mxu0 %v478_v1  ;;  %364 = vmatpush.bf16.msra.mxu2 %v495_v47  ;;  %v494_v48 = vld [vmem:[#allocation8 + $0x30] sm:$0xff]  ;;  %v493_v49 = vld [vmem:[#allocation8 + $0x28] sm:$0xff]  ;;  %v492_v50 = vld [vmem:[#allocation8 + $0x20] sm:$0xff] }
  0x1a   :  { %242 = vmatpush.bf16.msra.mxu1 %v486_v6  ;;  %v491_v51 = vld [vmem:[#allocation8 + $0x18] sm:$0xff]  ;;  %v506_v52 = vld [vmem:[%s735_s4] ss:$0 sm:$0xff]  ;;  %v490_v53 = vld [vmem:[#allocation8 + $0x10] sm:$0xff] }
  0x1b   :  { %v489_v56 = vld [vmem:[#allocation8 + $0x8] sm:$0xff]  ;;  %v488_v58 = vld [vmem:[#allocation8] sm:$0xff] }
  0x1c   :  { %409 = vmatmul.msk.bf16.vlgmr.msra.gmra.mxu0 %vm114_vm0, %v93_v4 }
  0x1d   :  { %365 = vmatpush.bf16.msra.mxu2 %v494_v48 }
  0x1e   :  { %243 = vmatpush.bf16.msra.mxu1 %v485_v7 }
  0x21   :  { %366 = vmatpush.bf16.msra.mxu2 %v493_v49 }
  0x22   :  { %244 = vmatpush.bf16.msra.mxu1 %v484_v8 }
  0x25   :  { %367 = vmatpush.bf16.msra.mxu2 %v492_v50 }
  0x26   :  { %245 = vmatpush.bf16.msra.mxu1 %v483_v9 }
  0x29   :  { %368 = vmatpush.bf16.msra.mxu2 %v491_v51 }
  0x2a   :  { %246 = vmatpush.bf16.msra.mxu1 %v482_v11 }
  0x2d   :  { %369 = vmatpush.bf16.msra.mxu2 %v490_v53 }
  0x2e   :  { %247 = vmatpush.bf16.msra.mxu1 %v481_v14 }
  0x31   :  { %370 = vmatpush.bf16.msra.mxu2 %v489_v56 }
  0x32   :  { %248 = vmatpush.bf16.msra.mxu1 %v480_v16 }
  0x35   :  { %371 = vmatpush.bf16.msra.mxu2 %v488_v58 }
  0x99   :  { %v127_v12 = vpop.f32.mrf.mxu0 }
  0x9a   :  { %v128_v13 = vadd.f32 %v505_v10, %v127_v12 }
  0x9c   :  { %v410_v15 = vmul.f32 -1.442695, %v128_v13 }
  0x9e   :  { %508 = vpow2.f32 %v410_v15 }
  0xa1   :  { %v129_v17 = vpop.f32.mrf.mxu0 }
  0xa2   :  { %v130_v18 = vadd.f32 %v505_v10, %v129_v17 }
  0xa4   :  { %v509_v19 = vpop.eup %508  ;;  %v411_v20 = vmul.f32 -1.442695, %v130_v18 }
  0xa5   :  { %v138_v21 = vadd.f32 1.0, %v509_v19 }
  0xa6   :  { %510 = vpow2.f32 %v411_v20 }
  0xa7   :  { %512 = vrcp.f32 %v138_v21  ;;  %v151_v31 = vand.u32 2147483648, %v138_v21  ;;  %vm145_vm2 = vweird.f32 %v138_v21  ;;  %v149_v32 = vand.u32 2147483647, %v138_v21 }
  0xa9   :  { %v152_v38 = vor.u32 1.1754944e-38, %v151_v31  ;;  %vm150_vm5 = vcmp.eq.f32.partialorder %v149_v32, 8.507059e+37 }
  0xac   :  { %v511_v22 = vpop.eup %510 }
  0xad   :  { %v513_v23 = vpop.eup %512  ;;  %v139_v24 = vadd.f32 1.0, %v511_v22 }
  0xae   :  { %v141_v25 = vmul.f32 %v513_v23, %v138_v21  ;;  %vm146_vm1 = vweird.f32 %v513_v23 }
  0xaf   :  { %514 = vrcp.f32 %v139_v24  ;;  %vm147_vm3 = vmor %vm145_vm2, %vm146_vm1  ;;  %v166_v34 = vand.u32 2147483648, %v139_v24  ;;  %v164_v37 = vand.u32 2147483647, %v139_v24  ;;  %vm160_vm6 = vweird.f32 %v139_v24 }
  0xb0   :  { %v142_v26 = vsub.f32 1.0, %v141_v25  ;;  %v507_v25 = vld [vmem:[%s737_s6] ss:$0 sm:$0xff] }
  0xb1   :  { %v167_v41 = vor.u32 1.1754944e-38, %v166_v34  ;;  %vm165_vm8 = vcmp.eq.f32.partialorder %v164_v37, 8.507059e+37 }
  0xb2   :  { %v143_v27 = vmul.f32 %v513_v23, %v142_v26 }
  0xb4   :  { %v144_v29 = vadd.f32 %v513_v23, %v143_v27 }
  0xb5   :  { %v515_v28 = vpop.eup %514 }
  0xb6   :  { %v156_v30 = vmul.f32 %v515_v28, %v139_v24  ;;  %v148_v35 = vsel %vm147_vm3, %v513_v23, %v144_v29  ;;  %vm161_vm4 = vweird.f32 %v515_v28 }
  0xb7   :  { %v153_v40 = vsel %vm150_vm5, %v152_v38, %v148_v35  ;;  %vm162_vm7 = vmor %vm160_vm6, %vm161_vm4 }
  0xb8   :  { %v157_v33 = vsub.f32 1.0, %v156_v30  ;;  %v170_v44 = vmul.f32 %v153_v40, %v128_v13 }
  0xba   :  { %v158_v36 = vmul.f32 %v515_v28, %v157_v33 }
  0xbc   :  { %v159_v39 = vadd.f32 %v515_v28, %v158_v36 }
  0xbe   :  { %v163_v42 = vsel %vm162_vm7, %v515_v28, %v159_v39 }
  0xbf   :  { %v168_v43 = vsel %vm165_vm8, %v167_v41, %v163_v42 }
  0xc0   :  { %v171_v45 = vmul.f32 %v168_v43, %v130_v18 }
  0xc2   :  { %v172_v46 = vpack.c.bf16 %v171_v45, %v170_v44 }
  0xc4   :  { %249 = vmatmul.bf16.vlgmr.msra.gmra.mxu1 %v172_v46 }
 0x141   :  { %v250_v54 = vpop.f32.mrf.mxu1 }
 0x142   :  { %v251_v55 = vadd.f32 %v506_v52, %v250_v54 }
 0x144   :  { %v444_v57 = vmul.f32 -1.442695, %v251_v55 }
 0x146   :  { %516 = vpow2.f32 %v444_v57 }
 0x149   :  { %v252_v59 = vpop.f32.mrf.mxu1 }
 0x14a   :  { %v253_v60 = vadd.f32 %v506_v52, %v252_v59 }
 0x14c   :  { %v517_v61 = vpop.eup %516  ;;  %v445_v62 = vmul.f32 -1.442695, %v253_v60 }
 0x14d   :  { %v261_v63 = vadd.f32 1.0, %v517_v61 }
 0x14e   :  { %518 = vpow2.f32 %v445_v62 }
 0x14f   :  { %520 = vrcp.f32 %v261_v63  ;;  %v274_v9 = vand.u32 2147483648, %v261_v63  ;;  %vm268_vm10 = vweird.f32 %v261_v63  ;;  %v272_v10 = vand.u32 2147483647, %v261_v63 }
 0x151   :  { %v275_v16 = vor.u32 1.1754944e-38, %v274_v9  ;;  %vm273_vm13 = vcmp.eq.f32.partialorder %v272_v10, 8.507059e+37 }
 0x154   :  { %v519_v0 = vpop.eup %518 }
 0x155   :  { %v521_v1 = vpop.eup %520  ;;  %v262_v2 = vadd.f32 1.0, %v519_v0 }
 0x156   :  { %v264_v3 = vmul.f32 %v521_v1, %v261_v63  ;;  %vm269_vm9 = vweird.f32 %v521_v1 }
 0x157   :  { %522 = vrcp.f32 %v262_v2  ;;  %vm270_vm11 = vmor %vm268_vm10, %vm269_vm9  ;;  %v289_v12 = vand.u32 2147483648, %v262_v2  ;;  %v287_v15 = vand.u32 2147483647, %v262_v2  ;;  %vm283_vm14 = vweird.f32 %v262_v2 }
 0x158   :  { %v265_v4 = vsub.f32 1.0, %v264_v3 }
 0x159   :  { %v290_v19 = vor.u32 1.1754944e-38, %v289_v12  ;;  %vm288_vm0 = vcmp.eq.f32.partialorder %v287_v15, 8.507059e+37 }
 0x15a   :  { %v266_v5 = vmul.f32 %v521_v1, %v265_v4 }
 0x15c   :  { %v267_v7 = vadd.f32 %v521_v1, %v266_v5 }
 0x15d   :  { %v523_v6 = vpop.eup %522 }
 0x15e   :  { %v279_v8 = vmul.f32 %v523_v6, %v262_v2  ;;  %v271_v13 = vsel %vm270_vm11, %v521_v1, %v267_v7  ;;  %vm284_vm12 = vweird.f32 %v523_v6 }
 0x15f   :  { %v276_v18 = vsel %vm273_vm13, %v275_v16, %v271_v13  ;;  %vm285_vm15 = vmor %vm283_vm14, %vm284_vm12 }
 0x160   :  { %v280_v11 = vsub.f32 1.0, %v279_v8  ;;  %v293_v22 = vmul.f32 %v276_v18, %v251_v55 }
 0x162   :  { %v281_v14 = vmul.f32 %v523_v6, %v280_v11 }
 0x164   :  { %v282_v17 = vadd.f32 %v523_v6, %v281_v14 }
 0x166   :  { %v286_v20 = vsel %vm285_vm15, %v523_v6, %v282_v17 }
 0x167   :  { %v291_v21 = vsel %vm288_vm0, %v290_v19, %v286_v20 }
 0x168   :  { %v294_v23 = vmul.f32 %v291_v21, %v253_v60 }
 0x16a   :  { %v295_v24 = vpack.c.bf16 %v294_v23, %v293_v22 }
 0x16c   :  { %372 = vmatmul.bf16.vlgmr.msra.gmra.mxu2 %v295_v24 }
 0x1ef   :  { %v373_v26 = vpop.f32.mrf.mxu2 }
 0x1f0   :  { %v374_v27 = vadd.f32 %v507_v25, %v373_v26 }
 0x1f2   :  { %378 = vst [vmem:[#allocation10] sm:$0xff] %v374_v27 }
 0x1f7   :  { %v375_v28 = vpop.f32.mrf.mxu2 }
 0x1f8   :  { %v376_v29 = vadd.f32 %v507_v25, %v375_v28 }
 0x1fa   :  { %379 = vst [vmem:[#allocation10 + $0x8] sm:$0xff] %v376_v29 }
 0x1fb   :  { %392 = dma.vmem_to_hbm [thread:$0]  %s385_s26, 256, %s387_s29, [#allocation4], %s656_s13, %s656_s13, %s657_s14  }
 0x1fc   :  { %650 = dma.done.wait [#allocation4], 256  }
 0x1fd   :  { %651 = vsyncadd [#allocation4], 4294967040 }
 0x1fe   :  { %397 = vsyncpa [#allocation3], 1 }
 0x1ff   :  { %398 = vsyncpa [#allocation6], 1 }
 0x200   :  { %399 = vsyncpa [#allocation9], 1 }
 0x201   :  { %400 = vsyncpa [#allocation4], 1 }

// kernel: tpu_custom_call.1
= control target key start
LH: loop header
LB: loop body
LE: loop exit
PB: predicated region body
PF: predicated region fallthrough
CT: control target
= control target key end

     0   :  { %12 = vsyncpa [#allocation3], 0  ;;  %s731_s0 = inlined_call_operand.hbm [shape: f32[16,32], index: 0, kind: input, shape index: {}]   ;;  %s732_s1 = inlined_call_operand.hbm [shape: bf16[32,128], index: 1, kind: input, shape index: {}]   ;;  %s733_s2 = inlined_call_operand.vmem [shape: f32[1,128], index: 2, kind: input, shape index: {}]   ;;  %s734_s3 = inlined_call_operand.hbm [shape: bf16[128,128], index: 3, kind: input, shape index: {}]   ;;  %s735_s4 = inlined_call_operand.vmem [shape: f32[1,128], index: 4, kind: input, shape index: {}]   ;;  %s736_s5 = inlined_call_operand.hbm [shape: bf16[128,128], index: 5, kind: input, shape index: {}]   ;;  %s737_s6 = inlined_call_operand.vmem [shape: f32[1,128], index: 6, kind: input, shape index: {}]   ;;  %s738_s7 = inlined_call_operand.hbm [shape: f32[16,128], index: 7, kind: output, shape index: {}]  }
   0x1   :  { %13 = vsyncpa [#allocation6], 0 }
   0x2   :  { %14 = vsyncpa [#allocation9], 0  ;;  %s33_s26 = sshll.u32 %s732_s1, 4  ;;  %s34_s26 = int_to_ptr.hbm [resolvable:$true] %s33_s26 }
   0x3   :  { %15 = vsyncpa [#allocation4], 0  ;;  %s652_s27 = smov [#allocation5]   ;;  %s20_s8 = sshll.u32 %s731_s0, 4  ;;  %s21_s8 = int_to_ptr.hbm [resolvable:$true] %s20_s8 }
   0x4   :  { %s35_s28 = sshll.u32 %s652_s27, 4  ;;  %s653_s9 = smov 64   ;;  %s36_s28 = int_to_ptr.vmem [resolvable:$true] %s35_s28 }
   0x5   :  { %s654_s10 = smov 4   ;;  %s655_s11 = smov [#allocation2]  }
   0x6   :  { %41 = dma.hbm_to_vmem [thread:$0]  %s34_s26, 256, %s36_s28, [#allocation6], %s653_s9, %s653_s9, %s654_s10  }
   0x7   :  { %s22_s12 = sshll.u32 %s655_s11, 4  ;;  %s656_s13 = smov 128   ;;  %s23_s12 = int_to_ptr.vmem [resolvable:$true] %s22_s12 }
   0x8   :  { %s657_s14 = smov 8   ;;  %s48_s16 = sshll.u32 %s734_s3, 4  ;;  %s49_s16 = int_to_ptr.hbm [resolvable:$true] %s48_s16 }
   0x9   :  { %28 = dma.hbm_to_vmem [thread:$0]  %s21_s8, 256, %s23_s12, [#allocation3], %s656_s13, %s656_s13, %s657_s14  }
   0xa   :  { %s658_s17 = smov [#allocation7]   ;;  %s63_s20 = sshll.u32 %s736_s5, 4  ;;  %s64_s20 = int_to_ptr.hbm [resolvable:$true] %s63_s20 }
   0xb   :  { %s50_s0 = sshll.u32 %s658_s17, 4  ;;  %s659_s21 = smov [#allocation8]   ;;  %s51_s0 = int_to_ptr.vmem [resolvable:$true] %s50_s0 }
   0xc   :  { %56 = dma.hbm_to_vmem [thread:$0]  %s49_s16, 1024, %s51_s0, [#allocation6], %s653_s9, %s653_s9, %s654_s10  }
   0xd   :  { %s65_s22 = sshll.u32 %s659_s21, 4  ;;  %s66_s22 = int_to_ptr.vmem [resolvable:$true] %s65_s22 }
   0xe   :  { %71 = dma.hbm_to_vmem [thread:$0]  %s64_s20, 1024, %s66_s22, [#allocation9], %s653_s9, %s653_s9, %s654_s10  }
   0xf   :  { %644 = dma.done.wait [#allocation3], 256  }
  0x10   :  { %645 = vsyncadd [#allocation3], 4294967040 }
  0x11   :  { %646 = dma.done.wait [#allocation6], 1280  }
  0x12   :  { %647 = vsyncadd [#allocation6], 4294966016 }
  0x13   :  { %648 = dma.done.wait [#allocation9], 1024  }
  0x14   :  { %649 = vsyncadd [#allocation9], 4294966272  ;;  %v479_v0 = vld [vmem:[#allocation5 + $0x8] sm:$0xff]  ;;  %v478_v1 = vld [vmem:[#allocation5] sm:$0xff]  ;;  %vm114_vm0 = vcmask 261120   ;;  %s660_s25 = smov [#allocation10]  }
  0x15   :  { %v91_v2 = vld [vmem:[#allocation2] sm:$0xff]  ;;  %124 = vmatpush.bf16.msra.mxu0 %v479_v0  ;;  %v92_v3 = vld [vmem:[#allocation2 + $0x8] sm:$0xff]  ;;  %v487_v5 = vld [vmem:[#allocation7 + $0x38] sm:$0xff]  ;;  %s384_s26 = sshll.u32 %s660_s25, 4  ;;  %s386_s29 = sshll.u32 %s738_s7, 4  ;;  %s385_s26 = int_to_ptr.vmem [resolvable:$true] %s384_s26  ;;  %s387_s29 = int_to_ptr.hbm [resolvable:$true] %s386_s29 }
  0x16   :  { %v93_v4 = vpack.c.bf16 %v92_v3, %v91_v2  ;;  %241 = vmatpush.bf16.msra.mxu1 %v487_v5  ;;  %v486_v6 = vld [vmem:[#allocation7 + $0x30] sm:$0xff]  ;;  %v485_v7 = vld [vmem:[#allocation7 + $0x28] sm:$0xff]  ;;  %v484_v8 = vld [vmem:[#allocation7 + $0x20] sm:$0xff] }
  0x17   :  { %v483_v9 = vld [vmem:[#allocation7 + $0x18] sm:$0xff]  ;;  %v505_v10 = vld [vmem:[%s733_s2] ss:$0 sm:$0xff]  ;;  %v482_v11 = vld [vmem:[#allocation7 + $0x10] sm:$0xff] }
  0x18   :  { %v481_v14 = vld [vmem:[#allocation7 + $0x8] sm:$0xff]  ;;  %v480_v16 = vld [vmem:[#allocation7] sm:$0xff]  ;;  %v495_v47 = vld [vmem:[#allocation8 + $0x38] sm:$0xff] }
  0x19   :  { %125 = vmatpush.bf16.msra.mxu0 %v478_v1  ;;  %364 = vmatpush.bf16.msra.mxu2 %v495_v47  ;;  %v494_v48 = vld [vmem:[#allocation8 + $0x30] sm:$0xff]  ;;  %v493_v49 = vld [vmem:[#allocation8 + $0x28] sm:$0xff]  ;;  %v492_v50 = vld [vmem:[#allocation8 + $0x20] sm:$0xff] }
  0x1a   :  { %242 = vmatpush.bf16.msra.mxu1 %v486_v6  ;;  %v491_v51 = vld [vmem:[#allocation8 + $0x18] sm:$0xff]  ;;  %v506_v52 = vld [vmem:[%s735_s4] ss:$0 sm:$0xff]  ;;  %v490_v53 = vld [vmem:[#allocation8 + $0x10] sm:$0xff] }
  0x1b   :  { %v489_v56 = vld [vmem:[#allocation8 + $0x8] sm:$0xff]  ;;  %v488_v58 = vld [vmem:[#allocation8] sm:$0xff] }
  0x1c   :  { %409 = vmatmul.msk.bf16.vlgmr.msra.gmra.mxu0 %vm114_vm0, %v93_v4 }
  0x1d   :  { %365 = vmatpush.bf16.msra.mxu2 %v494_v48 }
  0x1e   :  { %243 = vmatpush.bf16.msra.mxu1 %v485_v7 }
  0x21   :  { %366 = vmatpush.bf16.msra.mxu2 %v493_v49 }
  0x22   :  { %244 = vmatpush.bf16.msra.mxu1 %v484_v8 }
  0x25   :  { %367 = vmatpush.bf16.msra.mxu2 %v492_v50 }
  0x26   :  { %245 = vmatpush.bf16.msra.mxu1 %v483_v9 }
  0x29   :  { %368 = vmatpush.bf16.msra.mxu2 %v491_v51 }
  0x2a   :  { %246 = vmatpush.bf16.msra.mxu1 %v482_v11 }
  0x2d   :  { %369 = vmatpush.bf16.msra.mxu2 %v490_v53 }
  0x2e   :  { %247 = vmatpush.bf16.msra.mxu1 %v481_v14 }
  0x31   :  { %370 = vmatpush.bf16.msra.mxu2 %v489_v56 }
  0x32   :  { %248 = vmatpush.bf16.msra.mxu1 %v480_v16 }
  0x35   :  { %371 = vmatpush.bf16.msra.mxu2 %v488_v58 }
  0x99   :  { %v127_v12 = vpop.f32.mrf.mxu0 }
  0x9a   :  { %v128_v13 = vadd.f32 %v505_v10, %v127_v12 }
  0x9c   :  { %v410_v15 = vmul.f32 -1.442695, %v128_v13 }
  0x9e   :  { %508 = vpow2.f32 %v410_v15 }
  0xa1   :  { %v129_v17 = vpop.f32.mrf.mxu0 }
  0xa2   :  { %v130_v18 = vadd.f32 %v505_v10, %v129_v17 }
  0xa4   :  { %v509_v19 = vpop.eup %508  ;;  %v411_v20 = vmul.f32 -1.442695, %v130_v18 }
  0xa5   :  { %v138_v21 = vadd.f32 1.0, %v509_v19 }
  0xa6   :  { %510 = vpow2.f32 %v411_v20 }
  0xa7   :  { %512 = vrcp.f32 %v138_v21  ;;  %v151_v31 = vand.u32 2147483648, %v138_v21  ;;  %vm145_vm2 = vweird.f32 %v138_v21  ;;  %v149_v32 = vand.u32 2147483647, %v138_v21 }
  0xa9   :  { %v152_v38 = vor.u32 1.1754944e-38, %v151_v31  ;;  %vm150_vm5 = vcmp.eq.f32.partialorder %v149_v32, 8.507059e+37 }
  0xac   :  { %v511_v22 = vpop.eup %510 }
  0xad   :  { %v513_v23 = vpop.eup %512  ;;  %v139_v24 = vadd.f32 1.0, %v511_v22 }
  0xae   :  { %v141_v25 = vmul.f32 %v513_v23, %v138_v21  ;;  %vm146_vm1 = vweird.f32 %v513_v23 }
  0xaf   :  { %514 = vrcp.f32 %v139_v24  ;;  %vm147_vm3 = vmor %vm145_vm2, %vm146_vm1  ;;  %v166_v34 = vand.u32 2147483648, %v139_v24  ;;  %v164_v37 = vand.u32 2147483647, %v139_v24  ;;  %vm160_vm6 = vweird.f32 %v139_v24 }
  0xb0   :  { %v142_v26 = vsub.f32 1.0, %v141_v25  ;;  %v507_v25 = vld [vmem:[%s737_s6] ss:$0 sm:$0xff] }
  0xb1   :  { %v167_v41 = vor.u32 1.1754944e-38, %v166_v34  ;;  %vm165_vm8 = vcmp.eq.f32.partialorder %v164_v37, 8.507059e+37 }
  0xb2   :  { %v143_v27 = vmul.f32 %v513_v23, %v142_v26 }
  0xb4   :  { %v144_v29 = vadd.f32 %v513_v23, %v143_v27 }
  0xb5   :  { %v515_v28 = vpop.eup %514 }
  0xb6   :  { %v156_v30 = vmul.f32 %v515_v28, %v139_v24  ;;  %v148_v35 = vsel %vm147_vm3, %v513_v23, %v144_v29  ;;  %vm161_vm4 = vweird.f32 %v515_v28 }
  0xb7   :  { %v153_v40 = vsel %vm150_vm5, %v152_v38, %v148_v35  ;;  %vm162_vm7 = vmor %vm160_vm6, %vm161_vm4 }
  0xb8   :  { %v157_v33 = vsub.f32 1.0, %v156_v30  ;;  %v170_v44 = vmul.f32 %v153_v40, %v128_v13 }
  0xba   :  { %v158_v36 = vmul.f32 %v515_v28, %v157_v33 }
  0xbc   :  { %v159_v39 = vadd.f32 %v515_v28, %v158_v36 }
  0xbe   :  { %v163_v42 = vsel %vm162_vm7, %v515_v28, %v159_v39 }
  0xbf   :  { %v168_v43 = vsel %vm165_vm8, %v167_v41, %v163_v42 }
  0xc0   :  { %v171_v45 = vmul.f32 %v168_v43, %v130_v18 }
  0xc2   :  { %v172_v46 = vpack.c.bf16 %v171_v45, %v170_v44 }
  0xc4   :  { %249 = vmatmul.bf16.vlgmr.msra.gmra.mxu1 %v172_v46 }
 0x141   :  { %v250_v54 = vpop.f32.mrf.mxu1 }
 0x142   :  { %v251_v55 = vadd.f32 %v506_v52, %v250_v54 }
 0x144   :  { %v444_v57 = vmul.f32 -1.442695, %v251_v55 }
 0x146   :  { %516 = vpow2.f32 %v444_v57 }
 0x149   :  { %v252_v59 = vpop.f32.mrf.mxu1 }
 0x14a   :  { %v253_v60 = vadd.f32 %v506_v52, %v252_v59 }
 0x14c   :  { %v517_v61 = vpop.eup %516  ;;  %v445_v62 = vmul.f32 -1.442695, %v253_v60 }
 0x14d   :  { %v261_v63 = vadd.f32 1.0, %v517_v61 }
 0x14e   :  { %518 = vpow2.f32 %v445_v62 }
 0x14f   :  { %520 = vrcp.f32 %v261_v63  ;;  %v274_v9 = vand.u32 2147483648, %v261_v63  ;;  %vm268_vm10 = vweird.f32 %v261_v63  ;;  %v272_v10 = vand.u32 2147483647, %v261_v63 }
 0x151   :  { %v275_v16 = vor.u32 1.1754944e-38, %v274_v9  ;;  %vm273_vm13 = vcmp.eq.f32.partialorder %v272_v10, 8.507059e+37 }
 0x154   :  { %v519_v0 = vpop.eup %518 }
 0x155   :  { %v521_v1 = vpop.eup %520  ;;  %v262_v2 = vadd.f32 1.0, %v519_v0 }
 0x156   :  { %v264_v3 = vmul.f32 %v521_v1, %v261_v63  ;;  %vm269_vm9 = vweird.f32 %v521_v1 }
 0x157   :  { %522 = vrcp.f32 %v262_v2  ;;  %vm270_vm11 = vmor %vm268_vm10, %vm269_vm9  ;;  %v289_v12 = vand.u32 2147483648, %v262_v2  ;;  %v287_v15 = vand.u32 2147483647, %v262_v2  ;;  %vm283_vm14 = vweird.f32 %v262_v2 }
 0x158   :  { %v265_v4 = vsub.f32 1.0, %v264_v3 }
 0x159   :  { %v290_v19 = vor.u32 1.1754944e-38, %v289_v12  ;;  %vm288_vm0 = vcmp.eq.f32.partialorder %v287_v15, 8.507059e+37 }
 0x15a   :  { %v266_v5 = vmul.f32 %v521_v1, %v265_v4 }
 0x15c   :  { %v267_v7 = vadd.f32 %v521_v1, %v266_v5 }
 0x15d   :  { %v523_v6 = vpop.eup %522 }
 0x15e   :  { %v279_v8 = vmul.f32 %v523_v6, %v262_v2  ;;  %v271_v13 = vsel %vm270_vm11, %v521_v1, %v267_v7  ;;  %vm284_vm12 = vweird.f32 %v523_v6 }
 0x15f   :  { %v276_v18 = vsel %vm273_vm13, %v275_v16, %v271_v13  ;;  %vm285_vm15 = vmor %vm283_vm14, %vm284_vm12 }
 0x160   :  { %v280_v11 = vsub.f32 1.0, %v279_v8  ;;  %v293_v22 = vmul.f32 %v276_v18, %v251_v55 }
 0x162   :  { %v281_v14 = vmul.f32 %v523_v6, %v280_v11 }
 0x164   :  { %v282_v17 = vadd.f32 %v523_v6, %v281_v14 }
 0x166   :  { %v286_v20 = vsel %vm285_vm15, %v523_v6, %v282_v17 }
 0x167   :  { %v291_v21 = vsel %vm288_vm0, %v290_v19, %v286_v20 }
 0x168   :  { %v294_v23 = vmul.f32 %v291_v21, %v253_v60 }
 0x16a   :  { %v295_v24 = vpack.c.bf16 %v294_v23, %v293_v22 }
 0x16c   :  { %372 = vmatmul.bf16.vlgmr.msra.gmra.mxu2 %v295_v24 }
 0x1ef   :  { %v373_v26 = vpop.f32.mrf.mxu2 }
 0x1f0   :  { %v374_v27 = vadd.f32 %v507_v25, %v373_v26 }
 0x1f2   :  { %378 = vst [vmem:[#allocation10] sm:$0xff] %v374_v27 }
 0x1f7   :  { %v375_v28 = vpop.f32.mrf.mxu2 }
 0x1f8   :  { %v376_v29 = vadd.f32 %v507_v25, %v375_v28 }
 0x1fa   :  { %379 = vst [vmem:[#allocation10 + $0x8] sm:$0xff] %v376_v29 }
 0x1fb   :  { %392 = dma.vmem_to_hbm [thread:$0]  %s385_s26, 256, %s387_s29, [#allocation4], %s656_s13, %s656_s13, %s657_s14  }
 0x1fc   :  { %650 = dma.done.wait [#allocation4], 256  }
 0x1fd   :  { %651 = vsyncadd [#allocation4], 4294967040 }
 0x1fe   :  { %397 = vsyncpa [#allocation3], 1 }
 0x1ff   :  { %398 = vsyncpa [#allocation6], 1 }
 0x200   :  { %399 = vsyncpa [#allocation9], 1 }
 0x201   :  { %400 = vsyncpa [#allocation4], 1 }

</bundles_post_ra>
